<compile_context>
chip_gen: v5e
topology: v5e:2x2
jax: 0.10.0
libtpu: 0.0.40
codegen_flags: <defaults>
</compile_context>

<pallas_src>
import jax
import jax.numpy as jnp
from jax.experimental import pallas as pl
from jax.experimental.pallas import tpu as pltpu


def linear_kernel(w_ref, b_ref, xt_ref, ot_ref):
    """w_ref : VMEM (in_f_pad, 1) f32 weight column (zero-padded rows)
    b_ref : SMEM (1,)           f32 bias
    xt_ref: VMEM (in_f_pad, TB) x^T tile (batch on the lane axis)
    ot_ref: VMEM (1, TB)        output tile

    ot = sum_j w[j] * xt[j, :] + b
    Full-tile VPU multiply (lane-broadcast weight column) + sublane reduce."""
    x = xt_ref[...].astype(jnp.float32)                 # f32 accumulate (bf16 ok)
    prod = x * w_ref[...]                               # (in_f_pad, TB), vreg-dense
    ot_ref[...] = jnp.sum(prod, axis=0, keepdims=True) + b_ref[0]


def _round_up(n, m):
    return ((n + m - 1) // m) * m


def _pick_tiling(batch, max_tile):
    """Pick (tile_lanes, padded_batch).

    ntiles is chosen first, then the tile size, so padding waste stays below
    128 * ntiles lanes; the grid is kept at >= 2 (even) steps when the batch
    allows it so the two v7x TensorCores both get work."""
    b128 = _round_up(batch, 128)
    ntiles = pl.cdiv(b128, max_tile)
    if b128 >= 2 * 128:                  # enough rows for two 128-lane tiles
        ntiles = max(ntiles, 2)
        ntiles += ntiles % 2             # even split across 2 TensorCores
    tb = _round_up(pl.cdiv(b128, ntiles), 128)
    return tb, tb * ntiles


def linear_forward_lanemajor(xt, weight, bias, *, max_tile=65536):
    """Core entry point. xt: (in_f, B) lane-major activation slab (batch on the
    last, 128-lane axis) -- the layout a producer should emit directly so the
    op stays at a single HBM pass. Returns (B, out_f) f32."""
    in_f, B = xt.shape
    out_f = weight.shape[0]
    assert out_f == 1, "kernel specialized for nn.Linear(7, 1)"
    assert weight.shape[1] == in_f

    in_f_pad = _round_up(in_f, 8)        # one full sublane group
    tb, b_pad = _pick_tiling(B, max_tile)

    # Single fused pad; a no-op if the producer already supplies (8, b_pad).
    if (in_f, B) != (in_f_pad, b_pad):
        xt = jnp.pad(xt, ((0, in_f_pad - in_f), (0, b_pad - B)))

    # Zero-padded f32 weight column: padded x rows contribute exactly 0.
    w_col = jnp.pad(weight.astype(jnp.float32).T,
                    ((0, in_f_pad - in_f), (0, 0)))          # (in_f_pad, 1)
    b_vec = bias.reshape(-1).astype(jnp.float32)             # (1,) -> SMEM

    out_t = pl.pallas_call(
        linear_kernel,
        out_shape=jax.ShapeDtypeStruct((out_f, b_pad), jnp.float32),
        grid=(b_pad // tb,),
        in_specs=[
            pl.BlockSpec((in_f_pad, 1), lambda i: (0, 0)),        # weight column
            pl.BlockSpec(memory_space=pltpu.MemorySpace.SMEM),    # bias scalar
            pl.BlockSpec((in_f_pad, tb), lambda i: (0, i)),       # x^T tile
        ],
        out_specs=pl.BlockSpec((out_f, tb), lambda i: (0, i)),    # lane-dense out
        compiler_params=pltpu.CompilerParams(
            dimension_semantics=("parallel",),     # shard tiles across v7x TCs
            vmem_limit_bytes=32 * 1024 * 1024,     # explicit (v5e default is 16 MiB)
        ),
    )(w_col, b_vec, xt)

    # (1, B) -> (B, 1) is a pure reshape of the lane-dense slab (no copy).
    return out_t[:, :B].reshape(B, out_f)


def linear_forward(x, weight, bias, *, max_tile=65536):
    """PyTorch-layout adapter: x (B, in_f) -> (B, out_f).

    NOTE(perf): the x.T here is the one relayout pass the perf review flags;
    under jit it fuses with the pad inside linear_forward_lanemajor into a
    single copy.  Producers that can emit the (in_f, B) lane-major slab should
    call linear_forward_lanemajor directly and skip it entirely."""
    return linear_forward_lanemajor(x.T, weight, bias, max_tile=max_tile)


if __name__ == "__main__":
    key = jax.random.PRNGKey(0)
    kx, kw, kb = jax.random.split(key, 3)

    B, in_f, out_f = 8, 7, 1
    x = jax.random.normal(kx, (B, in_f), dtype=jnp.float32)

    # Deterministic params (mimics nn.Linear uniform(-1/sqrt(in), 1/sqrt(in))).
    bound = 1.0 / (in_f ** 0.5)
    weight = jax.random.uniform(kw, (out_f, in_f), jnp.float32, -bound, bound)
    bias = jax.random.uniform(kb, (out_f,), jnp.float32, -bound, bound)

    y = jax.jit(linear_forward)(x, weight, bias)
    jax.block_until_ready(y)

    # Pure-JAX reference check.
    y_ref = x @ weight.T + bias
    assert y.shape == (B, out_f)
    assert jnp.allclose(y, y_ref, atol=1e-5), "mismatch vs reference"
    print("KERNEL_OK")
</pallas_src>

<mosaic_0001>
module attributes {stable_mosaic.version = 11 : i64} {
  func.func @linear_kernel(%arg0: i32, %arg1: memref<8x1xf32, #tpu.memory_space<vmem>>, %arg2: memref<1xf32, #tpu.memory_space<smem>>, %arg3: memref<8x128xf32, #tpu.memory_space<vmem>>, %arg4: memref<1x128xf32, #tpu.memory_space<vmem>>) attributes {dimension_semantics = [#tpu.dimension_semantics<parallel>], iteration_bounds = array<i64: 1>, scalar_prefetch = 0 : i64, scratch_operands = 0 : i64, tpu.core_type = #tpu.core_type<tc>, window_params = [{pipeline_mode = #tpu.pipeline_mode<synchronous>, transform_indices = @transform_0, window_bounds = array<i64: 8, 1>}, {transform_indices = @transform_1, window_bounds = array<i64: 1>}, {transform_indices = @transform_2, window_bounds = array<i64: 8, 128>}, {transform_indices = @transform_3, window_bounds = array<i64: 1, 128>}]} {
    %c0 = arith.constant 0 : index
    %c0_0 = arith.constant 0 : index
    %0 = vector.load %arg3[%c0, %c0_0] : memref<8x128xf32, #tpu.memory_space<vmem>>, vector<8x128xf32>
    %c0_1 = arith.constant 0 : index
    %c0_2 = arith.constant 0 : index
    %1 = vector.load %arg1[%c0_1, %c0_2] : memref<8x1xf32, #tpu.memory_space<vmem>>, vector<8x1xf32>
    %2 = vector.broadcast %1 : vector<8x1xf32> to vector<8x128xf32>
    %3 = arith.mulf %0, %2 : vector<8x128xf32>
    %cst = arith.constant dense<0.000000e+00> : vector<128xf32>
    %4 = vector.multi_reduction <add>, %3, %cst [0] : vector<8x128xf32> to vector<128xf32>
    %5 = vector.shape_cast %4 : vector<128xf32> to vector<1x128xf32>
    %c0_3 = arith.constant 0 : index
    %6 = memref.load %arg2[%c0_3] : memref<1xf32, #tpu.memory_space<smem>>
    %7 = vector.broadcast %6 : f32 to vector<1x128xf32>
    %8 = arith.addf %5, %7 : vector<1x128xf32>
    %c0_4 = arith.constant 0 : index
    %c0_5 = arith.constant 0 : index
    %9 = vector.load %arg4[%c0_4, %c0_5] : memref<1x128xf32, #tpu.memory_space<vmem>>, vector<1x128xf32>
    tpu.vector_store %arg4[%c0_4, %c0_5], %8 {strides = array<i32>} : memref<1x128xf32, #tpu.memory_space<vmem>>, vector<1x128xf32>,
    return
  }
  func.func @transform_0(%arg0: i32) -> (i32, i32) {
    %c0_i32 = arith.constant 0 : i32
    %c0_i32_0 = arith.constant 0 : i32
    %c0_i32_1 = arith.constant 0 : i32
    return %c0_i32, %c0_i32_0 : i32, i32
  }
  func.func @transform_1(%arg0: i32) -> i32 {
    %c0_i32 = arith.constant 0 : i32
    %c0_i32_0 = arith.constant 0 : i32
    return %c0_i32 : i32
  }
  func.func @transform_2(%arg0: i32) -> (i32, i32) {
    %c0_i32 = arith.constant 0 : i32
    %c0_i32_0 = arith.constant 0 : i32
    return %c0_i32, %arg0 : i32, i32
  }
  func.func @transform_3(%arg0: i32) -> (i32, i32) {
    %c0_i32 = arith.constant 0 : i32
    %c0_i32_0 = arith.constant 0 : i32
    return %c0_i32, %arg0 : i32, i32
  }
}

</mosaic_0001>

<bundles_post_ra>
// kernel: linear_forward.1
= control target key start
LH: loop header
LB: loop body
LE: loop exit
PB: predicated region body
PF: predicated region fallthrough
CT: control target
= control target key end

     0   :  { %v39_v0 = vmov 0   ;;  %s72_s0 = inlined_call_operand.vmem [shape: f32[8,1], index: 0, kind: input, shape index: {}]   ;;  %s73_s2 = inlined_call_operand.vmem [shape: f32[8,128], index: 2, kind: input, shape index: {}]   ;;  %s74_s1 = inlined_call_operand.<no memory space> [shape: f32[1], index: 1, kind: input, shape index: {}]   ;;  %s75_s3 = inlined_call_operand.vmem [shape: f32[1,128], index: 3, kind: output, shape index: {}]  }
   0x1   :  { %38 = vset.pattern.permute.xlu0 %v39_v0  ;;  %v16_v1 = vld [vmem:[%s72_s0] sm:$0xff]  ;;  %v30_v10 = vstv %s74_s1 }
   0x2   :  { %19 = vperm.xlu0 %38, %v16_v1   ;;  %v15_v2 = vld [vmem:[%s73_s2] sm:$0xff] }
  0x74   :  { %v20_v3 = vpop.permute.xlu0 %19 }
  0x75   :  { %v22_v4 = vmul.f32 %v20_v3, %v15_v2 }
  0x77   :  { %v23_v5 = vrot.slane %v22_v4, 4 }
  0x79   :  { %v24_v6 = vadd.f32 %v23_v5, %v22_v4 }
  0x7b   :  { %v25_v7 = vrot.slane %v24_v6, 2 }
  0x7d   :  { %v26_v8 = vadd.f32 %v25_v7, %v24_v6 }
  0x7f   :  { %v27_v9 = vrot.slane %v26_v8, 1 }
  0x81   :  { %v28_v11 = vadd.f32 %v27_v9, %v26_v8 }
  0x83   :  { %v31_v12 = vadd.f32 %v30_v10, %v28_v11 }
  0x85   :  { %32 = vst [vmem:[%s75_s3] sm:$0x1] %v31_v12 }

</bundles_post_ra>
